<compile_context>
chip_gen: v7x
topology: tpu7x:2x2x1
jax: 0.10.0
libtpu: 0.0.40
codegen_flags: <defaults>
</compile_context>

<pallas_src>
import functools
import math

import jax
import jax.numpy as jnp
from jax import lax
from jax.experimental import pallas as pl
from jax.experimental.pallas import tpu as pltpu


# ----------------------------------------------------------------------------
# Fused CLIP layer kernel — one grid step == one batch element
# ----------------------------------------------------------------------------
def _clip_layer_kernel(x_ref,
                       ln1g_ref, ln1b_ref,
                       wqkv_ref, bqkv_ref, wo_ref, bo_ref,
                       ln2g_ref, ln2b_ref,
                       w1_ref, b1_ref, w2_ref, b2_ref,
                       o_ref, *, n_head, head_dim, eps):
    x = x_ref[...]                                   # (S, E) — one batch element
    E = n_head * head_dim

    def layernorm(v, g, b):
        mu = jnp.mean(v, axis=-1, keepdims=True)
        vc = v - mu
        var = jnp.mean(vc * vc, axis=-1, keepdims=True)
        return vc * lax.rsqrt(var + eps) * g + b

    # ---- pre-LN 1 ----
    h = layernorm(x, ln1g_ref[...], ln1b_ref[...])

    # ---- fused QKV projection: one MXU matmul instead of three ----
    qkv = jnp.dot(h, wqkv_ref[...], preferred_element_type=jnp.float32) + bqkv_ref[...]
    q = qkv[:, 0:E]
    k = qkv[:, E:2 * E]
    v = qkv[:, 2 * E:3 * E]

    # ---- multi-head self-attention (heads = DH-wide static lane-slices) ----
    scale = 1.0 / math.sqrt(head_dim)
    ctx_parts = []
    for hd in range(n_head):                         # static unrolled (n_head small)
        lo = hd * head_dim
        hi = lo + head_dim
        qh = q[:, lo:hi]
        kh = k[:, lo:hi]
        vh = v[:, lo:hi]
        # scores = qh @ kh^T without an explicit transpose
        s = lax.dot_general(qh, kh, (((1,), (1,)), ((), ())),
                            preferred_element_type=jnp.float32) * scale
        s = s - jnp.max(s, axis=-1, keepdims=True)
        p = jnp.exp(s)
        # EUP reciprocal instead of VALU divide (approx error ~1e-3, acceptable)
        p = p * pl.reciprocal(jnp.sum(p, axis=-1, keepdims=True), approx=True)
        ctx_parts.append(jnp.dot(p, vh, preferred_element_type=jnp.float32))
    ctx = jnp.concatenate(ctx_parts, axis=-1)        # (S, E)

    attn = jnp.dot(ctx, wo_ref[...], preferred_element_type=jnp.float32) + bo_ref[...]
    x = x + attn                                     # residual 1

    # ---- pre-LN 2 + MLP ----
    h2 = layernorm(x, ln2g_ref[...], ln2b_ref[...])
    up = jnp.dot(h2, w1_ref[...], preferred_element_type=jnp.float32) + b1_ref[...]
    # Reference computes exactly sigmoid(1.702 * x)  (NOT x * sigmoid(1.702 x))
    up = pl.reciprocal(1.0 + jnp.exp(-1.702 * up), approx=True)
    down = jnp.dot(up, w2_ref[...], preferred_element_type=jnp.float32) + b2_ref[...]
    o_ref[...] = x + down                            # residual 2


# ----------------------------------------------------------------------------
# pallas_call wrapper — grid over batch, weights VMEM-resident across steps
# ----------------------------------------------------------------------------
def _weight_spec(shape):
    nd = len(shape)
    return pl.BlockSpec(shape, lambda b, _nd=nd: (0,) * _nd)


def clip_layer_forward(params, x, *, n_head, eps=1e-5):
    """x: (seq, batch, n_emb) — nn.MultiheadAttention's default layout."""
    S, B, E = x.shape
    DH = E // n_head
    I = 4 * E

    # Put embed last, seq second-last (lane/sublane friendly); batch becomes the grid.
    xb = jnp.transpose(x, (1, 0, 2))                 # (B, S, E) — cheap outer-dim copy

    flops = B * (2 * S * E * (3 * E)                 # fused QKV
                 + n_head * (4 * S * S * DH)         # scores + ctx
                 + 2 * S * E * E                     # out proj
                 + 2 * S * E * I + 2 * S * I * E     # MLP
                 + 12 * S * E)                       # LN / residual elementwise
    transcendentals = B * (n_head * S * S + S * I + 2 * S)
    bytes_accessed = 4 * (2 * B * S * E
                          + E * 3 * E + 3 * E + E * E + E
                          + E * I + I + I * E + E + 4 * E)

    kern = functools.partial(_clip_layer_kernel, n_head=n_head, head_dim=DH, eps=eps)
    out = pl.pallas_call(
        kern,
        grid=(B,),
        in_specs=[
            pl.BlockSpec((None, S, E), lambda b: (b, 0, 0)),        # x (one batch elt)
            _weight_spec((1, E)), _weight_spec((1, E)),             # ln1 gamma/beta
            _weight_spec((E, 3 * E)), _weight_spec((1, 3 * E)),     # fused QKV
            _weight_spec((E, E)), _weight_spec((1, E)),             # out proj
            _weight_spec((1, E)), _weight_spec((1, E)),             # ln2 gamma/beta
            _weight_spec((E, I)), _weight_spec((1, I)),             # linear1
            _weight_spec((I, E)), _weight_spec((1, E)),             # linear2
        ],
        out_specs=pl.BlockSpec((None, S, E), lambda b: (b, 0, 0)),
        out_shape=jax.ShapeDtypeStruct((B, S, E), jnp.float32),
        compiler_params=pltpu.CompilerParams(dimension_semantics=("parallel",)),
        cost_estimate=pl.CostEstimate(flops=flops,
                                      transcendentals=transcendentals,
                                      bytes_accessed=bytes_accessed),
    )(
        xb,
        params["ln1_g"].reshape(1, E), params["ln1_b"].reshape(1, E),
        params["w_qkv"], params["b_qkv"].reshape(1, 3 * E),
        params["w_o"], params["b_o"].reshape(1, E),
        params["ln2_g"].reshape(1, E), params["ln2_b"].reshape(1, E),
        params["w1"], params["b1"].reshape(1, I),
        params["w2"], params["b2"].reshape(1, E),
    )
    return jnp.transpose(out, (1, 0, 2))             # back to (S, B, E)


# ----------------------------------------------------------------------------
# Deterministic synthetic parameters (no checkpoint loading allowed)
# ----------------------------------------------------------------------------
def init_params(key, n_emb, n_head):
    E = n_emb
    I = 4 * E
    ks = jax.random.split(key, 4)

    def w(k, fan_in, fan_out):
        return (1.0 / math.sqrt(fan_in)) * jax.random.normal(
            k, (fan_in, fan_out), jnp.float32)

    return {
        "ln1_g": jnp.ones((E,), jnp.float32), "ln1_b": jnp.zeros((E,), jnp.float32),
        "w_qkv": w(ks[0], E, 3 * E), "b_qkv": jnp.zeros((3 * E,), jnp.float32),
        "w_o": w(ks[1], E, E), "b_o": jnp.zeros((E,), jnp.float32),
        "ln2_g": jnp.ones((E,), jnp.float32), "ln2_b": jnp.zeros((E,), jnp.float32),
        "w1": w(ks[2], E, I), "b1": jnp.zeros((I,), jnp.float32),
        "w2": w(ks[3], I, E), "b2": jnp.zeros((E,), jnp.float32),
    }


if __name__ == "__main__":
    # (seq, batch, n_emb) matching nn.MultiheadAttention's default layout.
    S, B, E, NH = 8, 2, 32, 4
    key = jax.random.PRNGKey(0)
    kx, kp = jax.random.split(key)

    x = jax.random.normal(kx, (S, B, E), jnp.float32)
    params = init_params(kp, E, NH)

    y = clip_layer_forward(params, x, n_head=NH)
    jax.block_until_ready(y)
    assert y.shape == (S, B, E) and y.dtype == jnp.float32
    print("KERNEL_OK")
</pallas_src>

<mosaic_0001>
module attributes {stable_mosaic.version = 11 : i64} {
  func.func @_clip_layer_kernel(%arg0: i32, %arg1: memref<1x8x32xf32, #tpu.memory_space<vmem>>, %arg2: memref<1x32xf32, #tpu.memory_space<vmem>>, %arg3: memref<1x32xf32, #tpu.memory_space<vmem>>, %arg4: memref<32x96xf32, #tpu.memory_space<vmem>>, %arg5: memref<1x96xf32, #tpu.memory_space<vmem>>, %arg6: memref<32x32xf32, #tpu.memory_space<vmem>>, %arg7: memref<1x32xf32, #tpu.memory_space<vmem>>, %arg8: memref<1x32xf32, #tpu.memory_space<vmem>>, %arg9: memref<1x32xf32, #tpu.memory_space<vmem>>, %arg10: memref<32x128xf32, #tpu.memory_space<vmem>>, %arg11: memref<1x128xf32, #tpu.memory_space<vmem>>, %arg12: memref<128x32xf32, #tpu.memory_space<vmem>>, %arg13: memref<1x32xf32, #tpu.memory_space<vmem>>, %arg14: memref<1x8x32xf32, #tpu.memory_space<vmem>>) attributes {dimension_semantics = [#tpu.dimension_semantics<parallel>], iteration_bounds = array<i64: 2>, scalar_prefetch = 0 : i64, scratch_operands = 0 : i64, tpu.core_type = #tpu.core_type<tc>, window_params = [{transform_indices = @transform_0, window_bounds = array<i64: 1, 8, 32>}, {pipeline_mode = #tpu.pipeline_mode<synchronous>, transform_indices = @transform_1, window_bounds = array<i64: 1, 32>}, {pipeline_mode = #tpu.pipeline_mode<synchronous>, transform_indices = @transform_2, window_bounds = array<i64: 1, 32>}, {pipeline_mode = #tpu.pipeline_mode<synchronous>, transform_indices = @transform_3, window_bounds = array<i64: 32, 96>}, {pipeline_mode = #tpu.pipeline_mode<synchronous>, transform_indices = @transform_4, window_bounds = array<i64: 1, 96>}, {pipeline_mode = #tpu.pipeline_mode<synchronous>, transform_indices = @transform_5, window_bounds = array<i64: 32, 32>}, {pipeline_mode = #tpu.pipeline_mode<synchronous>, transform_indices = @transform_6, window_bounds = array<i64: 1, 32>}, {pipeline_mode = #tpu.pipeline_mode<synchronous>, transform_indices = @transform_7, window_bounds = array<i64: 1, 32>}, {pipeline_mode = #tpu.pipeline_mode<synchronous>, transform_indices = @transform_8, window_bounds = array<i64: 1, 32>}, {pipeline_mode = #tpu.pipeline_mode<synchronous>, transform_indices = @transform_9, window_bounds = array<i64: 32, 128>}, {pipeline_mode = #tpu.pipeline_mode<synchronous>, transform_indices = @transform_10, window_bounds = array<i64: 1, 128>}, {pipeline_mode = #tpu.pipeline_mode<synchronous>, transform_indices = @transform_11, window_bounds = array<i64: 128, 32>}, {pipeline_mode = #tpu.pipeline_mode<synchronous>, transform_indices = @transform_12, window_bounds = array<i64: 1, 32>}, {transform_indices = @transform_13, window_bounds = array<i64: 1, 8, 32>}]} {
    %c0 = arith.constant 0 : index
    %c0_0 = arith.constant 0 : index
    %c0_1 = arith.constant 0 : index
    %0 = vector.load %arg1[%c0, %c0_0, %c0_1] : memref<1x8x32xf32, #tpu.memory_space<vmem>>, vector<1x8x32xf32>
    %1 = vector.shape_cast %0 : vector<1x8x32xf32> to vector<8x32xf32>
    %c0_2 = arith.constant 0 : index
    %c0_3 = arith.constant 0 : index
    %2 = vector.load %arg2[%c0_2, %c0_3] : memref<1x32xf32, #tpu.memory_space<vmem>>, vector<1x32xf32>
    %c0_4 = arith.constant 0 : index
    %c0_5 = arith.constant 0 : index
    %3 = vector.load %arg3[%c0_4, %c0_5] : memref<1x32xf32, #tpu.memory_space<vmem>>, vector<1x32xf32>
    %cst = arith.constant dense<0.000000e+00> : vector<8xf32>
    %4 = vector.multi_reduction <add>, %1, %cst [1] : vector<8x32xf32> to vector<8xf32>
    %5 = vector.shape_cast %4 : vector<8xf32> to vector<8x1xf32>
    %cst_6 = arith.constant 3.200000e+01 : f32
    %6 = vector.broadcast %cst_6 : f32 to vector<8x1xf32>
    %7 = arith.divf %5, %6 : vector<8x1xf32>
    %8 = vector.broadcast %7 : vector<8x1xf32> to vector<8x32xf32>
    %9 = arith.subf %1, %8 : vector<8x32xf32>
    %10 = arith.mulf %9, %9 : vector<8x32xf32>
    %cst_7 = arith.constant dense<0.000000e+00> : vector<8xf32>
    %11 = vector.multi_reduction <add>, %10, %cst_7 [1] : vector<8x32xf32> to vector<8xf32>
    %12 = vector.shape_cast %11 : vector<8xf32> to vector<8x1xf32>
    %cst_8 = arith.constant 3.200000e+01 : f32
    %13 = vector.broadcast %cst_8 : f32 to vector<8x1xf32>
    %14 = arith.divf %12, %13 : vector<8x1xf32>
    %cst_9 = arith.constant 9.99999974E-6 : f32
    %15 = vector.broadcast %cst_9 : f32 to vector<8x1xf32>
    %16 = arith.addf %14, %15 : vector<8x1xf32>
    %17 = math.rsqrt %16 : vector<8x1xf32>
    %18 = vector.broadcast %17 : vector<8x1xf32> to vector<8x32xf32>
    %19 = arith.mulf %9, %18 : vector<8x32xf32>
    %20 = vector.broadcast %2 : vector<1x32xf32> to vector<8x32xf32>
    %21 = arith.mulf %19, %20 : vector<8x32xf32>
    %22 = vector.broadcast %3 : vector<1x32xf32> to vector<8x32xf32>
    %23 = arith.addf %21, %22 : vector<8x32xf32>
    %c0_10 = arith.constant 0 : index
    %c0_11 = arith.constant 0 : index
    %24 = vector.load %arg4[%c0_10, %c0_11] : memref<32x96xf32, #tpu.memory_space<vmem>>, vector<32x96xf32>
    %cst_12 = arith.constant dense<0.000000e+00> : vector<8x96xf32>
    %25 = tpu.matmul %23, %24, %cst_12 {dimension_numbers = #tpu.dot_dimension_numbers<[1], [0], [0], [1], [0, 0, 1, 1], [], []>} : vector<8x32xf32>, vector<32x96xf32>, vector<8x96xf32> -> vector<8x96xf32>
    %c0_13 = arith.constant 0 : index
    %c0_14 = arith.constant 0 : index
    %26 = vector.load %arg5[%c0_13, %c0_14] : memref<1x96xf32, #tpu.memory_space<vmem>>, vector<1x96xf32>
    %27 = vector.broadcast %26 : vector<1x96xf32> to vector<8x96xf32>
    %28 = arith.addf %25, %27 : vector<8x96xf32>
    %29 = vector.extract_strided_slice %28 {offsets = [0, 0], sizes = [8, 32], strides = [1, 1]} : vector<8x96xf32> to vector<8x32xf32>
    %30 = vector.extract_strided_slice %28 {offsets = [0, 32], sizes = [8, 32], strides = [1, 1]} : vector<8x96xf32> to vector<8x32xf32>
    %31 = vector.extract_strided_slice %28 {offsets = [0, 64], sizes = [8, 32], strides = [1, 1]} : vector<8x96xf32> to vector<8x32xf32>
    %32 = vector.extract_strided_slice %29 {offsets = [0, 0], sizes = [8, 8], strides = [1, 1]} : vector<8x32xf32> to vector<8x8xf32>
    %33 = vector.extract_strided_slice %30 {offsets = [0, 0], sizes = [8, 8], strides = [1, 1]} : vector<8x32xf32> to vector<8x8xf32>
    %34 = vector.extract_strided_slice %31 {offsets = [0, 0], sizes = [8, 8], strides = [1, 1]} : vector<8x32xf32> to vector<8x8xf32>
    %cst_15 = arith.constant dense<0.000000e+00> : vector<8x8xf32>
    %35 = tpu.matmul %32, %33, %cst_15 {dimension_numbers = #tpu.dot_dimension_numbers<[1], [1], [0], [0], [0, 0, 1, 0], [], []>} : vector<8x8xf32>, vector<8x8xf32>, vector<8x8xf32> -> vector<8x8xf32>
    %cst_16 = arith.constant 0.353553385 : f32
    %36 = vector.broadcast %cst_16 : f32 to vector<8x8xf32>
    %37 = arith.mulf %35, %36 : vector<8x8xf32>
    %cst_17 = arith.constant dense<0xFF800000> : vector<8xf32>
    %38 = vector.multi_reduction <maximumf>, %37, %cst_17 [1] : vector<8x8xf32> to vector<8xf32>
    %39 = vector.shape_cast %38 : vector<8xf32> to vector<8x1xf32>
    %40 = vector.broadcast %39 : vector<8x1xf32> to vector<8x8xf32>
    %41 = arith.subf %37, %40 : vector<8x8xf32>
    %42 = math.exp %41 : vector<8x8xf32>
    %cst_18 = arith.constant dense<0.000000e+00> : vector<8xf32>
    %43 = vector.multi_reduction <add>, %42, %cst_18 [1] : vector<8x8xf32> to vector<8xf32>
    %44 = vector.shape_cast %43 : vector<8xf32> to vector<8x1xf32>
    %45 = tpu.reciprocal %44 {approx = true} : vector<8x1xf32> -> vector<8x1xf32>
    %46 = vector.broadcast %45 : vector<8x1xf32> to vector<8x8xf32>
    %47 = arith.mulf %42, %46 : vector<8x8xf32>
    %cst_19 = arith.constant dense<0.000000e+00> : vector<8x8xf32>
    %48 = tpu.matmul %47, %34, %cst_19 {dimension_numbers = #tpu.dot_dimension_numbers<[1], [0], [0], [1], [0, 0, 1, 1], [], []>} : vector<8x8xf32>, vector<8x8xf32>, vector<8x8xf32> -> vector<8x8xf32>
    %49 = vector.extract_strided_slice %29 {offsets = [0, 8], sizes = [8, 8], strides = [1, 1]} : vector<8x32xf32> to vector<8x8xf32>
    %50 = vector.extract_strided_slice %30 {offsets = [0, 8], sizes = [8, 8], strides = [1, 1]} : vector<8x32xf32> to vector<8x8xf32>
    %51 = vector.extract_strided_slice %31 {offsets = [0, 8], sizes = [8, 8], strides = [1, 1]} : vector<8x32xf32> to vector<8x8xf32>
    %cst_20 = arith.constant dense<0.000000e+00> : vector<8x8xf32>
    %52 = tpu.matmul %49, %50, %cst_20 {dimension_numbers = #tpu.dot_dimension_numbers<[1], [1], [0], [0], [0, 0, 1, 0], [], []>} : vector<8x8xf32>, vector<8x8xf32>, vector<8x8xf32> -> vector<8x8xf32>
    %cst_21 = arith.constant 0.353553385 : f32
    %53 = vector.broadcast %cst_21 : f32 to vector<8x8xf32>
    %54 = arith.mulf %52, %53 : vector<8x8xf32>
    %cst_22 = arith.constant dense<0xFF800000> : vector<8xf32>
    %55 = vector.multi_reduction <maximumf>, %54, %cst_22 [1] : vector<8x8xf32> to vector<8xf32>
    %56 = vector.shape_cast %55 : vector<8xf32> to vector<8x1xf32>
    %57 = vector.broadcast %56 : vector<8x1xf32> to vector<8x8xf32>
    %58 = arith.subf %54, %57 : vector<8x8xf32>
    %59 = math.exp %58 : vector<8x8xf32>
    %cst_23 = arith.constant dense<0.000000e+00> : vector<8xf32>
    %60 = vector.multi_reduction <add>, %59, %cst_23 [1] : vector<8x8xf32> to vector<8xf32>
    %61 = vector.shape_cast %60 : vector<8xf32> to vector<8x1xf32>
    %62 = tpu.reciprocal %61 {approx = true} : vector<8x1xf32> -> vector<8x1xf32>
    %63 = vector.broadcast %62 : vector<8x1xf32> to vector<8x8xf32>
    %64 = arith.mulf %59, %63 : vector<8x8xf32>
    %cst_24 = arith.constant dense<0.000000e+00> : vector<8x8xf32>
    %65 = tpu.matmul %64, %51, %cst_24 {dimension_numbers = #tpu.dot_dimension_numbers<[1], [0], [0], [1], [0, 0, 1, 1], [], []>} : vector<8x8xf32>, vector<8x8xf32>, vector<8x8xf32> -> vector<8x8xf32>
    %66 = vector.extract_strided_slice %29 {offsets = [0, 16], sizes = [8, 8], strides = [1, 1]} : vector<8x32xf32> to vector<8x8xf32>
    %67 = vector.extract_strided_slice %30 {offsets = [0, 16], sizes = [8, 8], strides = [1, 1]} : vector<8x32xf32> to vector<8x8xf32>
    %68 = vector.extract_strided_slice %31 {offsets = [0, 16], sizes = [8, 8], strides = [1, 1]} : vector<8x32xf32> to vector<8x8xf32>
    %cst_25 = arith.constant dense<0.000000e+00> : vector<8x8xf32>
    %69 = tpu.matmul %66, %67, %cst_25 {dimension_numbers = #tpu.dot_dimension_numbers<[1], [1], [0], [0], [0, 0, 1, 0], [], []>} : vector<8x8xf32>, vector<8x8xf32>, vector<8x8xf32> -> vector<8x8xf32>
    %cst_26 = arith.constant 0.353553385 : f32
    %70 = vector.broadcast %cst_26 : f32 to vector<8x8xf32>
    %71 = arith.mulf %69, %70 : vector<8x8xf32>
    %cst_27 = arith.constant dense<0xFF800000> : vector<8xf32>
    %72 = vector.multi_reduction <maximumf>, %71, %cst_27 [1] : vector<8x8xf32> to vector<8xf32>
    %73 = vector.shape_cast %72 : vector<8xf32> to vector<8x1xf32>
    %74 = vector.broadcast %73 : vector<8x1xf32> to vector<8x8xf32>
    %75 = arith.subf %71, %74 : vector<8x8xf32>
    %76 = math.exp %75 : vector<8x8xf32>
    %cst_28 = arith.constant dense<0.000000e+00> : vector<8xf32>
    %77 = vector.multi_reduction <add>, %76, %cst_28 [1] : vector<8x8xf32> to vector<8xf32>
    %78 = vector.shape_cast %77 : vector<8xf32> to vector<8x1xf32>
    %79 = tpu.reciprocal %78 {approx = true} : vector<8x1xf32> -> vector<8x1xf32>
    %80 = vector.broadcast %79 : vector<8x1xf32> to vector<8x8xf32>
    %81 = arith.mulf %76, %80 : vector<8x8xf32>
    %cst_29 = arith.constant dense<0.000000e+00> : vector<8x8xf32>
    %82 = tpu.matmul %81, %68, %cst_29 {dimension_numbers = #tpu.dot_dimension_numbers<[1], [0], [0], [1], [0, 0, 1, 1], [], []>} : vector<8x8xf32>, vector<8x8xf32>, vector<8x8xf32> -> vector<8x8xf32>
    %83 = vector.extract_strided_slice %29 {offsets = [0, 24], sizes = [8, 8], strides = [1, 1]} : vector<8x32xf32> to vector<8x8xf32>
    %84 = vector.extract_strided_slice %30 {offsets = [0, 24], sizes = [8, 8], strides = [1, 1]} : vector<8x32xf32> to vector<8x8xf32>
    %85 = vector.extract_strided_slice %31 {offsets = [0, 24], sizes = [8, 8], strides = [1, 1]} : vector<8x32xf32> to vector<8x8xf32>
    %cst_30 = arith.constant dense<0.000000e+00> : vector<8x8xf32>
    %86 = tpu.matmul %83, %84, %cst_30 {dimension_numbers = #tpu.dot_dimension_numbers<[1], [1], [0], [0], [0, 0, 1, 0], [], []>} : vector<8x8xf32>, vector<8x8xf32>, vector<8x8xf32> -> vector<8x8xf32>
    %cst_31 = arith.constant 0.353553385 : f32
    %87 = vector.broadcast %cst_31 : f32 to vector<8x8xf32>
    %88 = arith.mulf %86, %87 : vector<8x8xf32>
    %cst_32 = arith.constant dense<0xFF800000> : vector<8xf32>
    %89 = vector.multi_reduction <maximumf>, %88, %cst_32 [1] : vector<8x8xf32> to vector<8xf32>
    %90 = vector.shape_cast %89 : vector<8xf32> to vector<8x1xf32>
    %91 = vector.broadcast %90 : vector<8x1xf32> to vector<8x8xf32>
    %92 = arith.subf %88, %91 : vector<8x8xf32>
    %93 = math.exp %92 : vector<8x8xf32>
    %cst_33 = arith.constant dense<0.000000e+00> : vector<8xf32>
    %94 = vector.multi_reduction <add>, %93, %cst_33 [1] : vector<8x8xf32> to vector<8xf32>
    %95 = vector.shape_cast %94 : vector<8xf32> to vector<8x1xf32>
    %96 = tpu.reciprocal %95 {approx = true} : vector<8x1xf32> -> vector<8x1xf32>
    %97 = vector.broadcast %96 : vector<8x1xf32> to vector<8x8xf32>
    %98 = arith.mulf %93, %97 : vector<8x8xf32>
    %cst_34 = arith.constant dense<0.000000e+00> : vector<8x8xf32>
    %99 = tpu.matmul %98, %85, %cst_34 {dimension_numbers = #tpu.dot_dimension_numbers<[1], [0], [0], [1], [0, 0, 1, 1], [], []>} : vector<8x8xf32>, vector<8x8xf32>, vector<8x8xf32> -> vector<8x8xf32>
    %100 = tpu.concatenate %48, %65, %82, %99 in 1 : vector<8x8xf32>, vector<8x8xf32>, vector<8x8xf32>, vector<8x8xf32> -> vector<8x32xf32>
    %c0_35 = arith.constant 0 : index
    %c0_36 = arith.constant 0 : index
    %101 = vector.load %arg6[%c0_35, %c0_36] : memref<32x32xf32, #tpu.memory_space<vmem>>, vector<32x32xf32>
    %cst_37 = arith.constant dense<0.000000e+00> : vector<8x32xf32>
    %102 = tpu.matmul %100, %101, %cst_37 {dimension_numbers = #tpu.dot_dimension_numbers<[1], [0], [0], [1], [0, 0, 1, 1], [], []>} : vector<8x32xf32>, vector<32x32xf32>, vector<8x32xf32> -> vector<8x32xf32>
    %c0_38 = arith.constant 0 : index
    %c0_39 = arith.constant 0 : index
    %103 = vector.load %arg7[%c0_38, %c0_39] : memref<1x32xf32, #tpu.memory_space<vmem>>, vector<1x32xf32>
    %104 = vector.broadcast %103 : vector<1x32xf32> to vector<8x32xf32>
    %105 = arith.addf %102, %104 : vector<8x32xf32>
    %106 = arith.addf %1, %105 : vector<8x32xf32>
    %c0_40 = arith.constant 0 : index
    %c0_41 = arith.constant 0 : index
    %107 = vector.load %arg8[%c0_40, %c0_41] : memref<1x32xf32, #tpu.memory_space<vmem>>, vector<1x32xf32>
    %c0_42 = arith.constant 0 : index
    %c0_43 = arith.constant 0 : index
    %108 = vector.load %arg9[%c0_42, %c0_43] : memref<1x32xf32, #tpu.memory_space<vmem>>, vector<1x32xf32>
    %cst_44 = arith.constant dense<0.000000e+00> : vector<8xf32>
    %109 = vector.multi_reduction <add>, %106, %cst_44 [1] : vector<8x32xf32> to vector<8xf32>
    %110 = vector.shape_cast %109 : vector<8xf32> to vector<8x1xf32>
    %cst_45 = arith.constant 3.200000e+01 : f32
    %111 = vector.broadcast %cst_45 : f32 to vector<8x1xf32>
    %112 = arith.divf %110, %111 : vector<8x1xf32>
    %113 = vector.broadcast %112 : vector<8x1xf32> to vector<8x32xf32>
    %114 = arith.subf %106, %113 : vector<8x32xf32>
    %115 = arith.mulf %114, %114 : vector<8x32xf32>
    %cst_46 = arith.constant dense<0.000000e+00> : vector<8xf32>
    %116 = vector.multi_reduction <add>, %115, %cst_46 [1] : vector<8x32xf32> to vector<8xf32>
    %117 = vector.shape_cast %116 : vector<8xf32> to vector<8x1xf32>
    %cst_47 = arith.constant 3.200000e+01 : f32
    %118 = vector.broadcast %cst_47 : f32 to vector<8x1xf32>
    %119 = arith.divf %117, %118 : vector<8x1xf32>
    %cst_48 = arith.constant 9.99999974E-6 : f32
    %120 = vector.broadcast %cst_48 : f32 to vector<8x1xf32>
    %121 = arith.addf %119, %120 : vector<8x1xf32>
    %122 = math.rsqrt %121 : vector<8x1xf32>
    %123 = vector.broadcast %122 : vector<8x1xf32> to vector<8x32xf32>
    %124 = arith.mulf %114, %123 : vector<8x32xf32>
    %125 = vector.broadcast %107 : vector<1x32xf32> to vector<8x32xf32>
    %126 = arith.mulf %124, %125 : vector<8x32xf32>
    %127 = vector.broadcast %108 : vector<1x32xf32> to vector<8x32xf32>
    %128 = arith.addf %126, %127 : vector<8x32xf32>
    %c0_49 = arith.constant 0 : index
    %c0_50 = arith.constant 0 : index
    %129 = vector.load %arg10[%c0_49, %c0_50] : memref<32x128xf32, #tpu.memory_space<vmem>>, vector<32x128xf32>
    %cst_51 = arith.constant dense<0.000000e+00> : vector<8x128xf32>
    %130 = tpu.matmul %128, %129, %cst_51 {dimension_numbers = #tpu.dot_dimension_numbers<[1], [0], [0], [1], [0, 0, 1, 1], [], []>} : vector<8x32xf32>, vector<32x128xf32>, vector<8x128xf32> -> vector<8x128xf32>
    %c0_52 = arith.constant 0 : index
    %c0_53 = arith.constant 0 : index
    %131 = vector.load %arg11[%c0_52, %c0_53] : memref<1x128xf32, #tpu.memory_space<vmem>>, vector<1x128xf32>
    %132 = vector.broadcast %131 : vector<1x128xf32> to vector<8x128xf32>
    %133 = arith.addf %130, %132 : vector<8x128xf32>
    %cst_54 = arith.constant -1.702000e+00 : f32
    %134 = vector.broadcast %cst_54 : f32 to vector<8x128xf32>
    %135 = arith.mulf %134, %133 : vector<8x128xf32>
    %136 = math.exp %135 : vector<8x128xf32>
    %cst_55 = arith.constant 1.000000e+00 : f32
    %137 = vector.broadcast %cst_55 : f32 to vector<8x128xf32>
    %138 = arith.addf %137, %136 : vector<8x128xf32>
    %139 = tpu.reciprocal %138 {approx = true} : vector<8x128xf32> -> vector<8x128xf32>
    %c0_56 = arith.constant 0 : index
    %c0_57 = arith.constant 0 : index
    %140 = vector.load %arg12[%c0_56, %c0_57] : memref<128x32xf32, #tpu.memory_space<vmem>>, vector<128x32xf32>
    %cst_58 = arith.constant dense<0.000000e+00> : vector<8x32xf32>
    %141 = tpu.matmul %139, %140, %cst_58 {dimension_numbers = #tpu.dot_dimension_numbers<[1], [0], [0], [1], [0, 0, 1, 1], [], []>} : vector<8x128xf32>, vector<128x32xf32>, vector<8x32xf32> -> vector<8x32xf32>
    %c0_59 = arith.constant 0 : index
    %c0_60 = arith.constant 0 : index
    %142 = vector.load %arg13[%c0_59, %c0_60] : memref<1x32xf32, #tpu.memory_space<vmem>>, vector<1x32xf32>
    %143 = vector.broadcast %142 : vector<1x32xf32> to vector<8x32xf32>
    %144 = arith.addf %141, %143 : vector<8x32xf32>
    %145 = arith.addf %106, %144 : vector<8x32xf32>
    %c0_61 = arith.constant 0 : index
    %c0_62 = arith.constant 0 : index
    %c0_63 = arith.constant 0 : index
    %146 = vector.load %arg14[%c0_61, %c0_62, %c0_63] : memref<1x8x32xf32, #tpu.memory_space<vmem>>, vector<1x8x32xf32>
    %147 = vector.shape_cast %146 : vector<1x8x32xf32> to vector<8x32xf32>
    %148 = vector.shape_cast %145 : vector<8x32xf32> to vector<1x8x32xf32>
    tpu.vector_store %arg14[%c0_61, %c0_62, %c0_63], %148 {strides = array<i32>} : memref<1x8x32xf32, #tpu.memory_space<vmem>>, vector<1x8x32xf32>,
    return
  }
  func.func @transform_0(%arg0: i32) -> (i32, i32, i32) {
    %c0_i32 = arith.constant 0 : i32
    %c0_i32_0 = arith.constant 0 : i32
    %c0_i32_1 = arith.constant 0 : i32
    return %arg0, %c0_i32, %c0_i32_0 : i32, i32, i32
  }
  func.func @transform_1(%arg0: i32) -> (i32, i32) {
    %c0_i32 = arith.constant 0 : i32
    %c0_i32_0 = arith.constant 0 : i32
    %c0_i32_1 = arith.constant 0 : i32
    return %c0_i32, %c0_i32_0 : i32, i32
  }
  func.func @transform_2(%arg0: i32) -> (i32, i32) {
    %c0_i32 = arith.constant 0 : i32
    %c0_i32_0 = arith.constant 0 : i32
    %c0_i32_1 = arith.constant 0 : i32
    return %c0_i32, %c0_i32_0 : i32, i32
  }
  func.func @transform_3(%arg0: i32) -> (i32, i32) {
    %c0_i32 = arith.constant 0 : i32
    %c0_i32_0 = arith.constant 0 : i32
    %c0_i32_1 = arith.constant 0 : i32
    return %c0_i32, %c0_i32_0 : i32, i32
  }
  func.func @transform_4(%arg0: i32) -> (i32, i32) {
    %c0_i32 = arith.constant 0 : i32
    %c0_i32_0 = arith.constant 0 : i32
    %c0_i32_1 = arith.constant 0 : i32
    return %c0_i32, %c0_i32_0 : i32, i32
  }
  func.func @transform_5(%arg0: i32) -> (i32, i32) {
    %c0_i32 = arith.constant 0 : i32
    %c0_i32_0 = arith.constant 0 : i32
    %c0_i32_1 = arith.constant 0 : i32
    return %c0_i32, %c0_i32_0 : i32, i32
  }
  func.func @transform_6(%arg0: i32) -> (i32, i32) {
    %c0_i32 = arith.constant 0 : i32
    %c0_i32_0 = arith.constant 0 : i32
    %c0_i32_1 = arith.constant 0 : i32
    return %c0_i32, %c0_i32_0 : i32, i32
  }
  func.func @transform_7(%arg0: i32) -> (i32, i32) {
    %c0_i32 = arith.constant 0 : i32
    %c0_i32_0 = arith.constant 0 : i32
    %c0_i32_1 = arith.constant 0 : i32
    return %c0_i32, %c0_i32_0 : i32, i32
  }
  func.func @transform_8(%arg0: i32) -> (i32, i32) {
    %c0_i32 = arith.constant 0 : i32
    %c0_i32_0 = arith.constant 0 : i32
    %c0_i32_1 = arith.constant 0 : i32
    return %c0_i32, %c0_i32_0 : i32, i32
  }
  func.func @transform_9(%arg0: i32) -> (i32, i32) {
    %c0_i32 = arith.constant 0 : i32
    %c0_i32_0 = arith.constant 0 : i32
    %c0_i32_1 = arith.constant 0 : i32
    return %c0_i32, %c0_i32_0 : i32, i32
  }
  func.func @transform_10(%arg0: i32) -> (i32, i32) {
    %c0_i32 = arith.constant 0 : i32
    %c0_i32_0 = arith.constant 0 : i32
    %c0_i32_1 = arith.constant 0 : i32
    return %c0_i32, %c0_i32_0 : i32, i32
  }
  func.func @transform_11(%arg0: i32) -> (i32, i32) {
    %c0_i32 = arith.constant 0 : i32
    %c0_i32_0 = arith.constant 0 : i32
    %c0_i32_1 = arith.constant 0 : i32
    return %c0_i32, %c0_i32_0 : i32, i32
  }
  func.func @transform_12(%arg0: i32) -> (i32, i32) {
    %c0_i32 = arith.constant 0 : i32
    %c0_i32_0 = arith.constant 0 : i32
    %c0_i32_1 = arith.constant 0 : i32
    return %c0_i32, %c0_i32_0 : i32, i32
  }
  func.func @transform_13(%arg0: i32) -> (i32, i32, i32) {
    %c0_i32 = arith.constant 0 : i32
    %c0_i32_0 = arith.constant 0 : i32
    %c0_i32_1 = arith.constant 0 : i32
    return %arg0, %c0_i32, %c0_i32_0 : i32, i32, i32
  }
}

</mosaic_0001>

<bundles_post_ra>
// kernel: tpu_custom_call.1
= control target key start
LH: loop header
LB: loop body
LE: loop exit
PB: predicated region body
PF: predicated region fallthrough
CT: control target
= control target key end

     0   :  { %s2374_s0 = inlined_call_operand.vmem [shape: f32[2,8,32], index: 0, kind: input, shape index: {}]   ;;  %s2375_s1 = inlined_call_operand.vmem [shape: f32[1,32], index: 1, kind: input, shape index: {}]   ;;  %s2376_s2 = inlined_call_operand.vmem [shape: f32[1,32], index: 2, kind: input, shape index: {}]   ;;  %s2377_s3 = inlined_call_operand.vmem [shape: f32[32,96], index: 3, kind: input, shape index: {}]   ;;  %s2378_s4 = inlined_call_operand.vmem [shape: f32[1,96], index: 4, kind: input, shape index: {}]   ;;  %s2379_s5 = inlined_call_operand.vmem [shape: f32[32,32], index: 5, kind: input, shape index: {}]   ;;  %s2380_s6 = inlined_call_operand.vmem [shape: f32[1,32], index: 6, kind: input, shape index: {}]   ;;  %s2381_s7 = inlined_call_operand.vmem [shape: f32[1,32], index: 7, kind: input, shape index: {}]   ;;  %s2382_s8 = inlined_call_operand.vmem [shape: f32[1,32], index: 8, kind: input, shape index: {}]   ;;  %s2383_s9 = inlined_call_operand.vmem [shape: f32[32,128], index: 9, kind: input, shape index: {}]   ;;  %s2384_s10 = inlined_call_operand.vmem [shape: f32[1,128], index: 10, kind: input, shape index: {}]   ;;  %s2385_s11 = inlined_call_operand.vmem [shape: f32[128,32], index: 11, kind: input, shape index: {}]   ;;  %s2386_s12 = inlined_call_operand.vmem [shape: f32[1,32], index: 12, kind: input, shape index: {}]   ;;  %s2387_s13 = inlined_call_operand.hbm [shape: f32[2,8,32], index: 13, kind: output, shape index: {}]  }
   0x1   :  { %2388 = sst [smem:[#allocation5_spill]] %s2374_s0 }
   0x2   :  { %2389 = sst [smem:[#allocation6_spill]] %s2375_s1 }
   0x3   :  { %2390 = sst [smem:[#allocation7_spill]] %s2376_s2 }
   0x4   :  { %18 = vsyncpa [#allocation3], 0 }
   0x5   :  { %20 = vsyncpa [#allocation3 + $0x1], 0  ;;  %s2067_s25 = smov 0   ;;  %s2069_s26 = smov 0  }
   0x6   :  { %s2071_s27 = smov 0   ;;  %s2073_s28 = smov 0  }
   0x7 LB: > { %s2088_s29 = sadd.s32 4294967295, %s1977_s28   ;;  %s1604_s30 = sadd.s32 4294967294, %s1977_s28   ;;  %s1977_s28 = sphi %s2073_s28, %s2399_s28   ;;  %s1973_s27 = sphi %s2071_s27, %s2398_s27   ;;  %s1969_s26 = sphi %s2069_s26, %s2397_s26   ;;  %s1965_s25 = sphi %s2067_s25, %s2396_s25  }
   0x8   : > { %s2092_s14 = sadd.s32 1, %s1977_s28   ;;  %s311_s15 = sadd.s32 1, %s1973_s27 }
   0x9   : > { %s308_s16 = ssub.s32 %s1977_s28, %s2092_s14  ;;  %p321_p0 = scmp.ne.s32.totalorder %s1973_s27, %s1969_s26 }
   0xa   : > { %p309_p1 = scmp.eq.s32.totalorder %s308_s16, 0  ;;  %p322_p2 = scmp.eq.s32.totalorder %s2088_s29, 1 }
   0xb   : > { %p327_p3 = scmp.ne.s32.totalorder %s1969_s26, %s1965_s25  ;;  %p328_p4 = scmp.eq.s32.totalorder %s1604_s30, 1 }
   0xc   : > { %s2103_s17 = scalar_select %p309_p1, %s1973_s27, %s311_s15  }
   0xd   : > { %p2105_p5 = por %p322_p2, %p321_p0  ;;  %p2109_p6 = por %p328_p4, %p327_p3 }
   0xe   : > { %p1607_p7 = scmp.ge.s32.totalorder %s1977_s28, 1  ;;  %p389_p8 = scmp.lt.s32.totalorder %s1977_s28, 3 }
  0x10   : > { %p390_p9 = pnand %p1607_p7, %p389_p8 }
  0x11   : > { %p432_p10 = scmp.lt.s32.totalorder (!%p390_p9), %s2088_s29, 1  ;;  %vm439_vm0 = vcmask (!%p390_p9), 261120   ;;  %s2393_s0 = sld [smem:[#allocation5_spill]] (!%p390_p9)  ;;  %v468_v7 = vld [vmem:[%s2377_s3] sm:$0xff] (!%p390_p9)  ;;  %v469_v8 = vld [vmem:[%s2377_s3 + $0x8] sm:$0xff] (!%p390_p9)  ;;  %v470_v9 = vld [vmem:[%s2377_s3 + $0x10] sm:$0xff] (!%p390_p9) }
  0x12   : > { %393 = sbr.rel (%p390_p9) target bundleno = 2549 (0x9f5), region = 72  ;;  %v1979_v10 = vmov (!%p390_p9), 0.0|0.0   ;;  %v1794_v11 = vpack.c.bf16 (!%p390_p9), %v469_v8, %v468_v7  ;;  %v471_v12 = vld [vmem:[%s2377_s3 + $0x18] sm:$0xff] (!%p390_p9)  ;;  %vm1980_vm1 = vmmov (!%p390_p9), 0   ;;  %v1981_v13 = vmov (!%p390_p9), 0.0   ;;  %s2394_s1 = sld [smem:[#allocation6_spill]] (!%p390_p9) }
  0x13   : > { %1793 = vmatprep.subr.bf16.mxu1 (!%p390_p9), %v1979_v10  ;;  %1693 = vmatprep.mubr.msk.f32.mxu1 (!%p390_p9), %vm1980_vm1, %v1981_v13  ;;  %v1797_v14 = vpack.c.bf16 (!%p390_p9), %v471_v12, %v470_v9  ;;  %s2395_s2 = sld [smem:[#allocation7_spill]] (!%p390_p9)  ;;  %v1612_v24 = vld [vmem:[%s2378_s4] ss:$0 sm:$0xff] (!%p390_p9)  ;;  %s1982_s23 = smov (!%p390_p9), 120   ;;  %vm555_vm2 = vcmask (!%p390_p9), 64512   ;;  %vm1229_vm3 = vcmask (!%p390_p9), 130048  }
  0x14   : > { %1706 = vmatprep.subr.mxu0 (!%p390_p9), %v1981_v13  ;;  %1708 = vmatprep.mubr.msk.f32.mxu0 (!%p390_p9), %vm1980_vm1, %v1981_v13  ;;  %s1984_s30 = smov (!%p390_p9), 88   ;;  %s1985_s15 = smov (!%p390_p9), 80   ;;  %vm1231_vm4 = vcmask (!%p390_p9), 195584  }
  0x15   : > { %1795 = vmatpush3.bf16.msra.mxu1 (!%p390_p9), %v1794_v11  ;;  %s1986_s16 = smov (!%p390_p9), 112   ;;  %s1989_s22 = smov (!%p390_p9), 64  }
  0x16   : > { %1796 = vmatprep.subr.bf16.mxu1 (!%p390_p9), %v1979_v10 }
  0x18   : > { %v1610_v19 = vld [vmem:[%s2394_s1] ss:$0 sm:$0xff] (!%p390_p9) }
  0x19   : > { %s433_s20 = scalar_select %p432_p10, %s2088_s29, 1  ;;  %1798 = vmatpush3.bf16.msra.mxu1 %v1797_v14  ;;  %v1611_v21 = vld [vmem:[%s2395_s2] ss:$0 sm:$0xff] }
  0x1a   : > { %1696 = vmatprep.subr.mxu1 %v1981_v13 }
  0x1b   : > { %s1609_s21 = sshll.u32 %s433_s20, 3  ;;  %s1987_s20 = smov 72  }
  0x1c   : > { %s435_s24 = scalar_lea.vmem %s2393_s0, %s1609_s21  ;;  %s1988_s21 = smov 104  }
  0x1d   : > { %v2120_v0 = vld [vmem:[%s435_s24] sm:$0xff]  ;;  %s1983_s24 = smov 96  }
  0x1e   : > { %v440_v1 = vsel %vm439_vm0, %v2120_v0, 0.0 }
  0x1f   : > { %441 = vadd.xlane.f32.xlu0 %v440_v1 }
  0xac   : > { %v442_v2 = vpop.xlane.xlu0 %441 }
  0xad   : > { %v444_v3 = vmul.f32 0.03125, %v442_v2 }
  0xaf   : > { %v445_v4 = vsub.f32 %v2120_v0, %v444_v3 }
  0xb1   : > { %v446_v5 = vmul.f32 %v445_v4, %v445_v4 }
  0xb3   : > { %v447_v6 = vsel %vm439_vm0, %v446_v5, 0.0 }
  0xb4   : > { %448 = vadd.xlane.f32.xlu0 %v447_v6 }
 0x141   : > { %v449_v15 = vpop.xlane.xlu0 %448 }
 0x142   : > { %v450_v16 = vmul.f32 0.03125, %v449_v15 }
 0x144   : > { %v451_v17 = vadd.f32 1e-05, %v450_v16 }
 0x146   : > { %1891 = vrsqrt.f32 %v451_v17 }
 0x150   : > { %v1892_v18 = vpop.eup %1891 }
 0x151   : > { %v453_v20 = vmul.f32 %v1892_v18, %v445_v4 }
 0x153   : > { %v460_v22 = vmul.f32 %v1610_v19, %v453_v20 }
 0x155   : > { %v467_v23 = vadd.f32 %v1611_v21, %v460_v22 }
 0x157   : > { %1694 = vmatmul.mubr.msk.f32.vlgmr.msra.gmra.mrb[0].mxu1 %vm439_vm0, %v467_v23 }
 0x158   : > { %1698 = vmatprep.mubr.msk.f32.mxu1 %vm1980_vm1, %v1981_v13 }
 0x22a   : > { %v548_v25 = vpop.f32.mrb[0].mxu1 }
 0x22b   : > { %v2158_v26 = vadd.f32 %v1612_v24, %v548_v25  ;;  %v1695_v27 = vpop.f32.mrb[1].mxu1 }
 0x22c   : > { %v1234_v27 = vld [vmem:[%s2379_s5 + $0x8] sm:$0xff] }
 0x22d   : > { %718 = vrot.lane.b32.xlu0 %v2158_v26, %s1982_s23  ;;  %553 = vrot.lane.b32.xlu1 %v2158_v26, %s1983_s24  ;;  %s1990_s23 = smov 48   ;;  %s1991_s24 = smov 40  }
 0x231   : > { %720 = vrot.lane.b32.xlu1 %v2158_v26, %s1984_s30  ;;  %s1992_s30 = smov 56  }
 0x235   : > { %886 = vrot.lane.b32.xlu1 %v2158_v26, %s1985_s15  ;;  %s1993_s15 = smov 8  }
 0x239   : > { %884 = vrot.lane.b32.xlu1 %v2158_v26, %s1986_s16  ;;  %s1994_s16 = smov 16  }
 0x23d   : > { %1052 = vrot.lane.b32.xlu1 %v2158_v26, %s1987_s20  ;;  %s1995_s20 = smov 24  }
 0x241   : > { %1050 = vrot.lane.b32.xlu1 %v2158_v26, %s1988_s21 }
 0x29f   : > { %v554_v28 = vpop.permute.xlu1 %553  ;;  %v719_v30 = vpop.permute.xlu0 %718 }
 0x2a0   : > { %1697 = vmatpush3.xpose.msk.msra.mxu1 %vm555_vm2, %v554_v28 }
 0x2a1   : > { %1701 = vmatprep.subr.mxu1 %v1981_v13 }
 0x2a3   : > { %1699 = vmatmul.mubr.msk.f32.vlgmr.msra.gmra.mrb[2].mxu1 %vm555_vm2, %v2158_v26  ;;  %v721_v29 = vpop.permute.xlu1 %720 }
 0x2a4   : > { %1707 = vmatpush3.xpose.msk.msra.mxu0 %vm555_vm2, %v721_v29  ;;  %1703 = vmatprep.mubr.msk.f32.mxu1 %vm1980_vm1, %v1981_v13 }
 0x2a5   : > { %1716 = vmatprep.subr.mxu0 %v1981_v13 }
 0x2a7   : > { %1709 = vmatmul.mubr.msk.f32.vlgmr.msra.gmra.mrb[0].mxu0 %vm555_vm2, %v719_v30  ;;  %v887_v31 = vpop.permute.xlu1 %886 }
 0x2a8   : > { %1717 = vmatpush3.xpose.msk.msra.mxu0 %vm555_vm2, %v887_v31  ;;  %1718 = vmatprep.mubr.msk.f32.mxu0 %vm1980_vm1, %v1981_v13  ;;  %v1235_v31 = vld [vmem:[%s2379_s5 + $0x10] sm:$0xff] }
 0x2a9   : > { %1726 = vmatprep.subr.mxu0 %v1981_v13 }
 0x2ab   : > { %v885_v32 = vpop.permute.xlu1 %884 }
 0x2ac   : > { %1719 = vmatmul.mubr.msk.f32.vlgmr.msra.gmra.mrb[2].mxu0 %vm555_vm2, %v885_v32  ;;  %v1236_v32 = vld [vmem:[%s2379_s5 + $0x18] sm:$0xff] }
 0x2ad   : > { %1728 = vmatprep.mubr.msk.f32.mxu0 %vm1980_vm1, %v1981_v13 }
 0x2af   : > { %v1053_v33 = vpop.permute.xlu1 %1052 }
 0x2b0   : > { %1727 = vmatpush3.xpose.msk.msra.mxu0 %vm555_vm2, %v1053_v33  ;;  %v1803_v33 = vpack.c.bf16 %v1236_v32, %v1235_v31  ;;  %v1451_v31 = vld [vmem:[%s2385_s11 + $0x78] sm:$0xff] }
 0x2b1   : > { %1811 = vmatprep.subr.bf16.mxu0 %v1979_v10 }
 0x2b3   : > { %v1051_v34 = vpop.permute.xlu1 %1050 }
 0x2b4   : > { %1729 = vmatmul.mubr.msk.f32.vlgmr.msra.gmra.mrb[4].mxu0 %vm555_vm2, %v1051_v34 }
 0x2b5   : > { %1790 = vmatprep.mubr.msk.f32.mxu0 %vm1980_vm1, %v1981_v13 }
 0x376   : > { %v626_v35 = vpop.f32.mrb[2].mxu1 }
 0x377   : > { %v630_v36 = vmul.f32 0.35355338, %v626_v35  ;;  %v1700_v37 = vpop.f32.mrb[3].mxu1 }
 0x379   : > { %v631_v38 = vsel %vm555_vm2, %v630_v36, -inf }
 0x37a   : > { %v792_v39 = vpop.f32.mrb[0].mxu0  ;;  %632 = vmax.xlane.f32.xlu1 %v631_v38 }
 0x37b   : > { %v796_v40 = vmul.f32 0.35355338, %v792_v39  ;;  %v1710_v41 = vpop.f32.mrb[1].mxu0 }
 0x37d   : > { %v797_v42 = vsel %vm555_vm2, %v796_v40, -inf }
 0x37e   : > { %798 = vmax.xlane.f32.xlu0 %v797_v42 }
 0x37f   : > { %v958_v43 = vpop.f32.mrb[2].mxu0 }
 0x380   : > { %v962_v44 = vmul.f32 0.35355338, %v958_v43  ;;  %v1720_v45 = vpop.f32.mrb[3].mxu0 }
 0x382   : > { %v963_v46 = vsel %vm555_vm2, %v962_v44, -inf }
 0x383   : > { %964 = vmax.xlane.f32.xlu1 %v963_v46  ;;  %v1626_v46 = vld [vmem:[%s2380_s6] ss:$0 sm:$0xff] }
 0x387   : > { %v1124_v47 = vpop.f32.mrb[4].mxu0 }
 0x388   : > { %v1128_v48 = vmul.f32 0.35355338, %v1124_v47  ;;  %v1730_v49 = vpop.f32.mrb[5].mxu0 }
 0x38a   : > { %v1129_v50 = vsel %vm555_vm2, %v1128_v48, -inf }
 0x38b   : > { %1130 = vmax.xlane.f32.xlu0 %v1129_v50 }
 0x394   : > { %642 = vrot.lane.b32.xlu1 %v2158_v26, %s1989_s22 }
 0x407   : > { %v633_v51 = vpop.xlane.xlu1 %632 }
 0x408   : > { %v634_v52 = vsub.f32 %v630_v36, %v633_v51 }
 0x40a   : > { %v635_v53 = vmul.f32 1.442695, %v634_v52 }
 0x40b   : > { %v799_v54 = vpop.xlane.xlu0 %798 }
 0x40c   : > { %1893 = vpow2.f32 %v635_v53  ;;  %v800_v55 = vsub.f32 %v796_v40, %v799_v54 }
 0x40e   : > { %v801_v56 = vmul.f32 1.442695, %v800_v55 }
 0x410   : > { %1895 = vpow2.f32 %v801_v56  ;;  %v965_v57 = vpop.xlane.xlu1 %964  ;;  %v1347_v56 = vld [vmem:[%s2383_s9] sm:$0xff] }
 0x411   : > { %v966_v58 = vsub.f32 %v962_v44, %v965_v57 }
 0x413   : > { %v967_v59 = vmul.f32 1.442695, %v966_v58  ;;  %v1349_v58 = vld [vmem:[%s2383_s9 + $0x10] sm:$0xff] }
 0x414   : > { %v643_v60 = vpop.permute.xlu1 %642 }
 0x415   : > { %1897 = vpow2.f32 %v967_v59  ;;  %1702 = vmatpush3.msra.mxu1 %v643_v60  ;;  %v1350_v59 = vld [vmem:[%s2383_s9 + $0x18] sm:$0xff] }
 0x416   : > { %v1894_v61 = vpop.eup %1893  ;;  %1711 = vmatprep.subr.mxu1 %v1981_v13  ;;  %v1809_v60 = vpack.c.bf16 %v1350_v59, %v1349_v58 }
 0x417   : > { %v637_v62 = vsel %vm555_vm2, %v1894_v61, 0.0 }
 0x418   : > { %v1131_v63 = vpop.xlane.xlu0 %1130  ;;  %638 = vadd.xlane.f32.xlu1 %v637_v62 }
 0x419   : > { %v1132_v1 = vsub.f32 %v1128_v48, %v1131_v63 }
 0x41a   : > { %v1896_v2 = vpop.eup %1895 }
 0x41b   : > { %v1133_v3 = vmul.f32 1.442695, %v1132_v1  ;;  %v803_v4 = vsel %vm555_vm2, %v1896_v2, 0.0 }
 0x41c   : > { %804 = vadd.xlane.f32.xlu0 %v803_v4  ;;  %v1629_v4 = vld [vmem:[%s2382_s8] ss:$0 sm:$0xff] }
 0x41d   : > { %1899 = vpow2.f32 %v1133_v3 }
 0x41f   : > { %v1898_v5 = vpop.eup %1897 }
 0x420   : > { %v969_v6 = vsel %vm555_vm2, %v1898_v5, 0.0 }
 0x421   : > { %970 = vadd.xlane.f32.xlu1 %v969_v6 }
 0x427   : > { %v1900_v7 = vpop.eup %1899 }
 0x428   : > { %v1135_v8 = vsel %vm555_vm2, %v1900_v7, 0.0 }
 0x429   : > { %1136 = vadd.xlane.f32.xlu0 %v1135_v8  ;;  %v1437_v8 = vld [vmem:[%s2385_s11 + $0x8] sm:$0xff] }
 0x432   : > { %974 = vrot.lane.b32.xlu1 %v2158_v26, %s1990_s23  ;;  %s1634_s23 = sshll.u32 %s2088_s29, 7 }
 0x433   : > { %s2331_s1 = scalar_lea.hbm %s2387_s13, %s1634_s23 }
 0x436   : > { %1140 = vrot.lane.b32.xlu1 %v2158_v26, %s1991_s24 }
 0x43f   : > { %808 = vrot.lane.b32.xlu0 %v2158_v26, %s1992_s30  ;;  %v1233_v26 = vld [vmem:[%s2379_s5] sm:$0xff] }
 0x440   : > { %v1800_v28 = vpack.c.bf16 %v1234_v27, %v1233_v26  ;;  %v1448_v27 = vld [vmem:[%s2385_s11 + $0x60] sm:$0xff] }
 0x4a5   : > { %v639_v9 = vpop.xlane.xlu1 %638 }
 0x4a6   : > { %1901 = vrcp.f32 %v639_v9 }
 0x4a9   : > { %v805_v11 = vpop.xlane.xlu0 %804 }
 0x4aa   : > { %1903 = vrcp.f32 %v805_v11  ;;  %v1438_v11 = vld [vmem:[%s2385_s11 + $0x10] sm:$0xff] }
 0x4ae   : > { %v971_v12 = vpop.xlane.xlu1 %970 }
 0x4af   : > { %1905 = vrcp.f32 %v971_v12  ;;  %v1439_v12 = vld [vmem:[%s2385_s11 + $0x18] sm:$0xff] }
 0x4b0   : > { %v1902_v14 = vpop.eup %1901 }
 0x4b1   : > { %v641_v15 = vmul.f32 %v1902_v14, %v1894_v61  ;;  %v1815_v14 = vpack.c.bf16 %v1439_v12, %v1438_v11 }
 0x4b2   : > { %v975_v19 = vpop.permute.xlu1 %974 }
 0x4b3   : > { %1704 = vmatmul.mubr.msk.f32.vlgmr.msra.gmra.mrb[4].mxu1 %vm555_vm2, %v641_v15  ;;  %v1440_v15 = vld [vmem:[%s2385_s11 + $0x20] sm:$0xff] }
 0x4b4   : > { %1713 = vmatprep.mubr.msk.f32.mxu1 %vm1980_vm1, %v1981_v13  ;;  %v1904_v17 = vpop.eup %1903 }
 0x4b5   : > { %v807_v18 = vmul.f32 %v1904_v17, %v1896_v2  ;;  %v1628_v2 = vld [vmem:[%s2381_s7] ss:$0 sm:$0xff] }
 0x4b6   : > { %v1137_v16 = vpop.xlane.xlu0 %1136  ;;  %v1141_v23 = vpop.permute.xlu1 %1140 }
 0x4b7   : > { %1907 = vrcp.f32 %v1137_v16  ;;  %v1441_v16 = vld [vmem:[%s2385_s11 + $0x28] sm:$0xff] }
 0x4b8   : > { %v1818_v17 = vpack.c.bf16 %v1441_v16, %v1440_v15 }
 0x4b9   : > { %v1906_v21 = vpop.eup %1905 }
 0x4ba   : > { %v809_v20 = vpop.permute.xlu0 %808  ;;  %v973_v22 = vmul.f32 %v1906_v21, %v1898_v5  ;;  %v1444_v21 = vld [vmem:[%s2385_s11 + $0x40] sm:$0xff] }
 0x4bb   : > { %1712 = vmatpush3.msra.mxu1 %v809_v20 }
 0x4bc   : > { %1714 = vmatmul.mubr.msk.f32.vlgmr.msra.gmra.mrb[6].mxu1 %vm555_vm2, %v807_v18  ;;  %1721 = vmatprep.subr.mxu1 %v1981_v13  ;;  %v1442_v18 = vld [vmem:[%s2385_s11 + $0x30] sm:$0xff] }
 0x4bd   : > { %1722 = vmatpush3.msra.mxu1 %v975_v19  ;;  %1723 = vmatprep.mubr.msk.f32.mxu1 %vm1980_vm1, %v1981_v13  ;;  %v1443_v19 = vld [vmem:[%s2385_s11 + $0x38] sm:$0xff] }
 0x4be   : > { %1731 = vmatprep.subr.mxu1 %v1981_v13  ;;  %v1821_v20 = vpack.c.bf16 %v1443_v19, %v1442_v18 }
 0x4c0   : > { %1724 = vmatmul.mubr.msk.f32.vlgmr.msra.gmra.mrb[8].mxu1 %vm555_vm2, %v973_v22  ;;  %v1445_v22 = vld [vmem:[%s2385_s11 + $0x48] sm:$0xff] }
 0x4c1   : > { %v1908_v24 = vpop.eup %1907  ;;  %1732 = vmatpush3.msra.mxu1 %v1141_v23  ;;  %1733 = vmatprep.mubr.msk.f32.mxu1 %vm1980_vm1, %v1981_v13  ;;  %v1824_v23 = vpack.c.bf16 %v1445_v22, %v1444_v21 }
 0x4c2   : > { %v1139_v25 = vmul.f32 %v1908_v24, %v1900_v7  ;;  %1799 = vmatprep.subr.bf16.mxu1 %v1979_v10  ;;  %v1436_v7 = vld [vmem:[%s2385_s11] sm:$0xff]  ;;  %v1446_v24 = vld [vmem:[%s2385_s11 + $0x50] sm:$0xff] }
 0x4c3   : > { %v1812_v9 = vpack.c.bf16 %v1437_v8, %v1436_v7 }
 0x4c4   : > { %1734 = vmatmul.mubr.msk.f32.vlgmr.msra.gmra.mrb[10].mxu1 %vm555_vm2, %v1139_v25  ;;  %v1447_v25 = vld [vmem:[%s2385_s11 + $0x58] sm:$0xff] }
 0x4c5   : > { %1744 = vmatprep.mubr.msk.f32.mxu1 %vm1980_vm1, %v1981_v13  ;;  %1801 = vmatpush3.bf16.msra.mxu1 %v1800_v28  ;;  %v1827_v26 = vpack.c.bf16 %v1447_v25, %v1446_v24  ;;  %v1449_v28 = vld [vmem:[%s2385_s11 + $0x68] sm:$0xff] }
 0x4c6   : > { %1802 = vmatprep.subr.bf16.mxu1 %v1979_v10  ;;  %1813 = vmatpush3.bf16.msra.mxu0 %v1812_v9 }
 0x4c7   : > { %1814 = vmatprep.subr.bf16.mxu0 %v1979_v10 }
 0x4c9   : > { %1804 = vmatpush3.bf16.msra.mxu1 %v1803_v33  ;;  %v1630_v33 = vld [vmem:[%s2384_s10] ss:$0 sm:$0xff] }
 0x4ca   : > { %1805 = vmatprep.subr.bf16.mxu1 %v1979_v10  ;;  %1816 = vmatpush3.bf16.msra.mxu0 %v1815_v14 }
 0x4cb   : > { %1817 = vmatprep.subr.bf16.mxu0 %v1979_v10 }
 0x4ce   : > { %1819 = vmatpush3.bf16.msra.mxu0 %v1818_v17 }
 0x4cf   : > { %1820 = vmatprep.subr.bf16.mxu0 %v1979_v10 }
 0x4d2   : > { %1822 = vmatpush3.bf16.msra.mxu0 %v1821_v20 }
 0x4d3   : > { %1823 = vmatprep.subr.bf16.mxu0 %v1979_v10 }
 0x4d6   : > { %1825 = vmatpush3.bf16.msra.mxu0 %v1824_v23 }
 0x4d7   : > { %1826 = vmatprep.subr.bf16.mxu0 %v1979_v10 }
 0x4da   : > { %1828 = vmatpush3.bf16.msra.mxu0 %v1827_v26 }
 0x4db   : > { %1829 = vmatprep.subr.bf16.mxu0 %v1979_v10 }
 0x586   : > { %v714_v29 = vpop.f32.mrb[4].mxu1 }
 0x587   : > { %v1705_v30 = vpop.f32.mrb[5].mxu1 }
 0x588   : > { %v1450_v30 = vld [vmem:[%s2385_s11 + $0x70] sm:$0xff] }
 0x589   : > { %v1833_v32 = vpack.c.bf16 %v1451_v31, %v1450_v30 }
 0x58f   : > { %v880_v34 = vpop.f32.mrb[6].mxu1 }
 0x590   : > { %1217 = vrot.lane.b32.xlu0 %v880_v34, %s1993_s15  ;;  %v1715_v35 = vpop.f32.mrb[7].mxu1 }
 0x593   : > { %v1046_v36 = vpop.f32.mrb[8].mxu1 }
 0x594   : > { %1221 = vrot.lane.b32.xlu1 %v1046_v36, %s1994_s16  ;;  %v1725_v37 = vpop.f32.mrb[9].mxu1  ;;  %s429_s16 = sand.u32 1, %s1969_s26  }
 0x595   : > { %s1532_s21 = scalar_lea.sflag [#allocation3], %s429_s16 }
 0x597   : > { %v1212_v38 = vpop.f32.mrb[10].mxu1 }
 0x598   : > { %1225 = vrot.lane.b32.xlu0 %v1212_v38, %s1995_s20  ;;  %v1735_v39 = vpop.f32.mrb[11].mxu1  ;;  %s1608_s20 = sshll.u32 %s429_s16, 3 }
 0x599   : > { %s431_s24 = scalar_lea.vmem [#allocation2], %s1608_s20  ;;  %s1996_s20 = smov [#allocation2]  }
 0x59a   : > { %s1545_s30 = sshll.u32 %s431_s24, 4  ;;  %s1919_s22 = sshll.u32 %s1996_s20, 4  ;;  %s2333_s30 = int_to_ptr.vmem [resolvable:$true] %s1545_s30  ;;  %s1920_s22 = int_to_ptr.vmem [resolvable:$false] %s1919_s22 }
 0x59b   : > { %s1915_s29 = scalar_lea.vmem %s2333_s30, 128  ;;  %s1921_s2 = scalar_lea.vmem %s1920_s22, 256 }
 0x59c   : > { %p1916_p11 = scmp.ne.s32.totalorder %s2333_s30, %s1915_s29  ;;  %p1922_p0 = scmp.lt.s32.totalorder %s2333_s30, %s1920_s22 }
 0x59d   : > { %p1923_p1 = scmp.lt.s32.totalorder %s1921_s2, %s1915_s29 }
 0x59e   : > { %p1917_p12 = pnand %p1916_p11, %p2105_p5 }
 0x59f   : > { %p1924_p2 = por %p1923_p1, %p1922_p0 }
 0x5a0   : > { %p1918_p13 = pneg %p1917_p12 }
 0x5a2   : > { %p1925_p3 = pnand %p1924_p2, %p1918_p13 }
 0x602   : > { %v1218_v40 = vpop.permute.xlu0 %1217 }
 0x603   : > { %v1228_v42 = vsel %vm555_vm2, %v714_v29, %v1218_v40  ;;  %v1830_v29 = vpack.c.bf16 %v1449_v28, %v1448_v27 }
 0x605   : > { %1831 = vmatpush3.bf16.msra.mxu0 %v1830_v29 }
 0x606   : > { %v1222_v41 = vpop.permute.xlu1 %1221  ;;  %1832 = vmatprep.subr.bf16.mxu0 %v1979_v10 }
 0x607   : > { %v1230_v43 = vsel %vm1229_vm3, %v1228_v42, %v1222_v41 }
 0x609   : > { %1834 = vmatpush3.bf16.msra.mxu0 %v1833_v32 }
 0x60a   : > { %v1226_v44 = vpop.permute.xlu0 %1225 }
 0x60b   : > { %v1232_v45 = vsel %vm1231_vm4, %v1230_v43, %v1226_v44 }
 0x60c   : > { %1745 = vmatmul.mubr.msk.f32.vlgmr.msra.gmra.mrb[12].mxu1 %vm439_vm0, %v1232_v45 }
 0x60d   : > { %1755 = vmatprep.mubr.msk.f32.mxu1 %vm1980_vm1, %v1981_v13 }
 0x6df   : > { %v1313_v47 = vpop.f32.mrb[12].mxu1 }
 0x6e0   : > { %v1314_v48 = vadd.f32 %v1626_v46, %v1313_v47  ;;  %v1746_v49 = vpop.f32.mrb[13].mxu1 }
 0x6e2   : > { %v2238_v50 = vadd.f32 %v1314_v48, %v2120_v0  ;;  %v1348_v0 = vld [vmem:[%s2383_s9 + $0x8] sm:$0xff] }
 0x6e3   : > { %v1806_v57 = vpack.c.bf16 %v1348_v0, %v1347_v56 }
 0x6e4   : > { %v1320_v51 = vsel %vm439_vm0, %v2238_v50, 0.0 }
 0x6e5   : > { %1321 = vadd.xlane.f32.xlu1 %v1320_v51  ;;  %1807 = vmatpush3.bf16.msra.mxu1 %v1806_v57 }
 0x6e6   : > { %1808 = vmatprep.subr.bf16.mxu1 %v1979_v10  ;;  %v1632_v10 = vld [vmem:[%s2386_s12] ss:$0 sm:$0xff] }
 0x6e9   : > { %1810 = vmatpush3.bf16.msra.mxu1 %v1809_v60 }
 0x772   : > { %v1322_v52 = vpop.xlane.xlu1 %1321 }
 0x773   : > { %v1323_v53 = vmul.f32 0.03125, %v1322_v52 }
 0x775   : > { %v1324_v54 = vsub.f32 %v2238_v50, %v1323_v53 }
 0x777   : > { %v1325_v55 = vmul.f32 %v1324_v54, %v1324_v54 }
 0x779   : > { %v1326_v13 = vsel %vm439_vm0, %v1325_v55, 0.0 }
 0x77a   : > { %1327 = vadd.xlane.f32.xlu0 %v1326_v13 }
 0x807   : > { %v1328_v61 = vpop.xlane.xlu0 %1327 }
 0x808   : > { %v1329_v62 = vmul.f32 0.03125, %v1328_v61 }
 0x80a   : > { %v1330_v63 = vadd.f32 1e-05, %v1329_v62 }
 0x80c   : > { %1909 = vrsqrt.f32 %v1330_v63 }
 0x816   : > { %v1910_v1 = vpop.eup %1909 }
 0x817   : > { %v1332_v3 = vmul.f32 %v1910_v1, %v1324_v54 }
 0x819   : > { %v1339_v5 = vmul.f32 %v1628_v2, %v1332_v3 }
 0x81b   : > { %v1346_v6 = vadd.f32 %v1629_v4, %v1339_v5 }
 0x81d   : > { %1756 = vmatmul.mubr.msk.f32.vlgmr.msra.gmra.mrb[14].mxu1 %vm439_vm0, %v1346_v6 }
 0x8f0   : > { %v1427_v34 = vpop.f32.mrb[14].mxu1 }
 0x8f1   : > { %v1428_v35 = vadd.f32 %v1630_v33, %v1427_v34  ;;  %v1757_v36 = vpop.f32.mrb[15].mxu1 }
 0x8f3   : > { %v1431_v37 = vmul.f32 -1.702, %v1428_v35 }
 0x8f5   : > { %v1432_v38 = vmul.f32 1.442695, %v1431_v37 }
 0x8f7   : > { %1911 = vpow2.f32 %v1432_v38 }
 0x901   : > { %v1912_v39 = vpop.eup %1911 }
 0x902   : > { %v1434_v40 = vadd.f32 1.0, %v1912_v39 }
 0x904   : > { %1913 = vrcp.f32 %v1434_v40 }
 0x90e   : > { %v1914_v41 = vpop.eup %1913 }
 0x90f   : > { %1791 = vmatmul.mubr.f32.vlgmr.msra.gmra.mrb[6].mxu0 %v1914_v41 }
 0x9e2   : > { %v1525_v42 = vpop.f32.mrb[6].mxu0 }
 0x9e3   : > { %v1526_v43 = vadd.f32 %v1632_v10, %v1525_v42  ;;  %v1792_v44 = vpop.f32.mrb[7].mxu0 }
 0x9e5   : > { %v1529_v45 = vadd.f32 %v1526_v43, %v2238_v50 }
 0x9e7   : > { %1530 = vst.msk [vmem:[%s431_s24] sm:$0xff] %vm439_vm0, %v1529_v45 }
 0x9e8   : > { %1928 = shalt.err (!%p1925_p3)
}
 0x9e9   : > { %s1929_s16 = scalar_lea.hbm %s2331_s1, 128  ;;  %s1933_s0 = scalar_lea.hbm %s2387_s13, 256 }
 0x9ea   : > { %p1930_p4 = scmp.ne.s32.totalorder %s2331_s1, %s1929_s16  ;;  %p1934_p9 = scmp.lt.u32.totalorder %s2331_s1, %s2387_s13 }
 0x9eb   : > { %p1935_p10 = scmp.lt.u32.totalorder %s1933_s0, %s1929_s16  ;;  %p1937_p12 = scmp.lt.u32.totalorder %s1929_s16, %s2331_s1 }
 0x9ec   : > { %p1931_p7 = pnand %p1930_p4, %p2105_p5 }
 0x9ed   : > { %p1936_p11 = por %p1935_p10, %p1934_p9 }
 0x9ee   : > { %p1932_p8 = pneg %p1931_p7 }
 0x9ef   : > { %p1938_p13 = por %p1937_p12, %p1936_p11 }
 0x9f1   : > { %p1939_p0 = pnand %p1938_p13, %p1932_p8 }
 0x9f3   : > { %1942 = shalt.err (!%p1939_p0)
}
 0x9f4   : > { %1835 = dma.vmem_to_hbm [thread:$0]  (%p2105_p5), %s2333_s30, 128, %s2331_s1, %s1532_s21  }
 0x9f5 PF: > { %p1841_p1 = scmp.ge.s32.totalorder %s1977_s28, 2  ;;  %s1557_s2 = sand.u32 1, %s1965_s25  }
 0x9f6   : > { %s1558_s29 = scalar_lea.sflag [#allocation3], %s1557_s2 }
 0x9f7   : > { %p1838_p2 = pnand %p1841_p1, %p2109_p6 }
 0x9f9   : > { %1960 = dma.done.wait (!%p1838_p2), %s1558_s29, 128  }
 0x9fa   : > { %1962 = vsyncadd (!%p1838_p2), %s1558_s29, 4294967168  ;;  %p23_p3 = scmp.ge.s32.totalorder %s2092_s14, 4   ;;  %s2396_s25 = smov %s1969_s26 }
 0x9fb   : > { %s2397_s26 = smov %s1973_s27  ;;  %s2398_s27 = smov %s2103_s17 }
 0x9fc   : > { %s2399_s28 = smov %s2092_s14  ;;  %25 = sbr.rel (!%p23_p3) target bundleno = 7 (0x7), region = 107 }
 0xa03   :  { %1563 = vsyncpa [#allocation3], 1 }
 0xa04   :  { %1565 = vsyncpa [#allocation3 + $0x1], 1 }

</bundles_post_ra>
